<compile_context>
chip_gen: v7x
topology: tpu7x:2x2x1
jax: 0.10.0
libtpu: 0.0.40
codegen_flags: <defaults>
</compile_context>

<pallas_src>
import functools

import jax
import jax.numpy as jnp
from jax.experimental import pallas as pl
from jax.experimental.pallas import tpu as pltpu


def scaling_kernel(x_ref, w1t_ref, b1_ref, w2t_ref, b2_ref, out_ref, acc_ref,
                   *, n_rows, tile_n, steps, needs_mask):
    # x_ref:(TN, Din) f32     w1t_ref:(Din, H) f32   b1_ref:(1, H) f32
    # w2t_ref:(H, Dout) f32   b2_ref:(1, Dout) f32
    # out_ref:(1, Dout) f32   acc_ref:(1, H) f32 scratch (batch-sum of hidden)
    s = pl.program_id(0)  # batch-tile step (reduction axis, "arbitrary")

    @pl.when(s == 0)
    def _init():
        acc_ref[...] = jnp.zeros_like(acc_ref)

    # Linear-1 (f32 MXU) + bias + relu (VPU).  Kernel is HBM-bound on the x
    # stream, so doing this in full f32 is free and keeps exact semantics.
    h = jnp.dot(x_ref[...], w1t_ref[...], preferred_element_type=jnp.float32)
    h = jnp.maximum(h + b1_ref[...], 0.0)

    if needs_mask:
        last = steps - 1

        @pl.when(s != last)
        def _full_tile():
            acc_ref[...] += jnp.sum(h, axis=0, keepdims=True)

        @pl.when(s == last)
        def _tail_tile():
            # Rows past N hold unspecified data (x is streamed unpadded);
            # discard them (including NaN/Inf) before accumulating.
            rows = s * tile_n + jax.lax.broadcasted_iota(jnp.int32, h.shape, 0)
            hm = jnp.where(rows < n_rows, h, 0.0)
            acc_ref[...] += jnp.sum(hm, axis=0, keepdims=True)
    else:
        acc_ref[...] += jnp.sum(h, axis=0, keepdims=True)

    @pl.when(s == steps - 1)
    def _finalize():
        # Mean hoisted above the affine Linear-2 (mathematically exact):
        # run the tiny (1,H)x(H,Dout) matmul once, in f32, on the true N.
        mean_h = acc_ref[...] * (1.0 / n_rows)
        y = jnp.dot(mean_h, w2t_ref[...], preferred_element_type=jnp.float32)
        out_ref[...] = y + b2_ref[...]


def _round_up(a, m):
    return (a + m - 1) // m * m


def scaling_forward(x, w1, b1, w2, b2, way, *, tile_n=4096,
                    vmem_limit_bytes=None):
    """Fused Scaling forward. Returns [x1 (way, way), x2 (way,)].

    tile_n: batch rows per grid step.  4096 keeps the x double-buffer plus the
            in-kernel (tn, H) f32 temporary comfortably under v5e's 16 MiB
            scoped-VMEM default; raise it (and vmem_limit_bytes) on v6e/v7x.
    """
    N, Din = x.shape
    H = w1.shape[0]
    Dout = w2.shape[0]
    assert Dout == way * way + way, "final Linear out-dim must be way*way + way"

    x = x.astype(jnp.float32)
    w1t = jnp.asarray(w1, jnp.float32).T              # (Din, H)
    b1r = jnp.asarray(b1, jnp.float32).reshape(1, H)
    w2t = jnp.asarray(w2, jnp.float32).T              # (H, Dout)
    b2r = jnp.asarray(b2, jnp.float32).reshape(1, Dout)

    # Sublane-aligned batch tile; single (possibly partial) block for small N.
    tn = max(8, _round_up(min(tile_n, _round_up(N, 8)), 8))
    steps = -(-N // tn)                                # ceil(N / tn)
    needs_mask = (steps * tn != N)

    kernel = functools.partial(
        scaling_kernel, n_rows=N, tile_n=tn, steps=steps, needs_mask=needs_mask)

    flops = 2 * N * Din * H + 2 * H * Dout
    bytes_accessed = (x.size + w1t.size + b1r.size + w2t.size + b2r.size
                      + Dout) * 4

    cp_kwargs = dict(dimension_semantics=("arbitrary",))
    if vmem_limit_bytes is not None:
        cp_kwargs["vmem_limit_bytes"] = vmem_limit_bytes

    out = pl.pallas_call(
        kernel,
        out_shape=jax.ShapeDtypeStruct((1, Dout), jnp.float32),
        grid_spec=pltpu.PrefetchScalarGridSpec(
            num_scalar_prefetch=0,
            grid=(steps,),
            in_specs=[
                # x: streamed, unpadded batch tiles (double-buffered).
                pl.BlockSpec((tn, Din), lambda s: (s, 0)),
                # Weights / biases: constant index_map -> VMEM-resident.
                pl.BlockSpec((Din, H), lambda s: (0, 0)),
                pl.BlockSpec((1, H), lambda s: (0, 0)),
                pl.BlockSpec((H, Dout), lambda s: (0, 0)),
                pl.BlockSpec((1, Dout), lambda s: (0, 0)),
            ],
            # Single (1, Dout) result, written once at the last grid step.
            out_specs=pl.BlockSpec((1, Dout), lambda s: (0, 0)),
            scratch_shapes=[pltpu.VMEM((1, H), jnp.float32)],
        ),
        compiler_params=pltpu.CompilerParams(**cp_kwargs),
        cost_estimate=pl.CostEstimate(
            flops=flops, transcendentals=0, bytes_accessed=bytes_accessed),
    )(x, w1t, b1r, w2t, b2r)

    flat = out[0]
    x1 = flat[: way * way].reshape(way, way)
    x2 = flat[way * way:].reshape(way)
    return [x1, x2]


def kaiming_normal(key, shape):
    # torch.nn.init.kaiming_normal_ defaults: fan_in, a=0 -> std = sqrt(2/fan_in)
    fan_in = shape[1]
    std = (2.0 / fan_in) ** 0.5
    return jax.random.normal(key, shape, dtype=jnp.float32) * std


def _reference(x, w1, b1, w2, b2, way):
    # Pure-f32 reference matching the PyTorch module semantics.
    y = jnp.maximum(x @ w1.T + b1, 0.0) @ w2.T + b2
    m = jnp.mean(y, axis=0)
    return m[: way * way].reshape(way, way), m[way * way:]


if __name__ == "__main__":
    # Shapes consistent with the module:
    #   way = 4 -> final output dim = way*way + way = 20
    #   config_scal = [('Linear',(64,32)), ('relu',[True]), ('Linear',(20,64))]
    way = 4
    N, Din, H = 8, 32, 64
    Dout = way * way + way

    key = jax.random.PRNGKey(0)
    kx, kw1, kw2 = jax.random.split(key, 3)

    x = jax.random.normal(kx, (N, Din), dtype=jnp.float32)
    w1 = kaiming_normal(kw1, (H, Din))             # Linear 1: (out, in)
    b1 = jnp.zeros((H,), dtype=jnp.float32)
    w2 = kaiming_normal(kw2, (Dout, H))            # Linear 2: (out, in)
    b2 = jnp.zeros((Dout,), dtype=jnp.float32)

    x1, x2 = scaling_forward(x, w1, b1, w2, b2, way)
    jax.block_until_ready(x1)
    jax.block_until_ready(x2)

    assert x1.shape == (way, way) and x2.shape == (way,)
    x1_ref, x2_ref = _reference(x, w1, b1, w2, b2, way)
    assert jnp.allclose(x1, x1_ref, atol=2e-2, rtol=2e-2), "x1 mismatch"
    assert jnp.allclose(x2, x2_ref, atol=2e-2, rtol=2e-2), "x2 mismatch"

    # Also exercise the non-divisible-batch tail path (partial last block,
    # gated mask) with a small forced tile.
    N2 = 24
    x_big = jax.random.normal(jax.random.PRNGKey(1), (N2, Din), jnp.float32)
    y1, y2 = scaling_forward(x_big, w1, b1, w2, b2, way, tile_n=16)
    jax.block_until_ready(y1)
    jax.block_until_ready(y2)
    y1_ref, y2_ref = _reference(x_big, w1, b1, w2, b2, way)
    assert jnp.allclose(y1, y1_ref, atol=2e-2, rtol=2e-2), "tail x1 mismatch"
    assert jnp.allclose(y2, y2_ref, atol=2e-2, rtol=2e-2), "tail x2 mismatch"

    print("KERNEL_OK")
</pallas_src>

<mosaic_0001>
module attributes {stable_mosaic.version = 11 : i64} {
  func.func @scaling_kernel(%arg0: i32, %arg1: memref<8x32xf32, #tpu.memory_space<vmem>>, %arg2: memref<32x64xf32, #tpu.memory_space<vmem>>, %arg3: memref<1x64xf32, #tpu.memory_space<vmem>>, %arg4: memref<64x20xf32, #tpu.memory_space<vmem>>, %arg5: memref<1x20xf32, #tpu.memory_space<vmem>>, %arg6: memref<1x20xf32, #tpu.memory_space<vmem>>, %arg7: memref<1x64xf32, #tpu.memory_space<vmem>>) attributes {dimension_semantics = [#tpu.dimension_semantics<arbitrary>], iteration_bounds = array<i64: 1>, scalar_prefetch = 0 : i64, scratch_operands = 1 : i64, tpu.core_type = #tpu.core_type<tc>, window_params = [{transform_indices = @transform_0, window_bounds = array<i64: 8, 32>}, {pipeline_mode = #tpu.pipeline_mode<synchronous>, transform_indices = @transform_1, window_bounds = array<i64: 32, 64>}, {pipeline_mode = #tpu.pipeline_mode<synchronous>, transform_indices = @transform_2, window_bounds = array<i64: 1, 64>}, {pipeline_mode = #tpu.pipeline_mode<synchronous>, transform_indices = @transform_3, window_bounds = array<i64: 64, 20>}, {pipeline_mode = #tpu.pipeline_mode<synchronous>, transform_indices = @transform_4, window_bounds = array<i64: 1, 20>}, {pipeline_mode = #tpu.pipeline_mode<synchronous>, transform_indices = @transform_5, window_bounds = array<i64: 1, 20>}]} {
    %c0_i32 = arith.constant 0 : i32
    %0 = arith.cmpi eq, %arg0, %c0_i32 : i32
    %1 = arith.extui %0 : i1 to i32
    %c0_i32_0 = arith.constant 0 : i32
    %2 = arith.cmpi ne, %1, %c0_i32_0 : i32
    scf.if %2 {
      %cst_14 = arith.constant 0.000000e+00 : f32
      %19 = vector.broadcast %cst_14 : f32 to vector<1x64xf32>
      %c0_15 = arith.constant 0 : index
      %c0_16 = arith.constant 0 : index
      %20 = vector.load %arg7[%c0_15, %c0_16] : memref<1x64xf32, #tpu.memory_space<vmem>>, vector<1x64xf32>
      tpu.vector_store %arg7[%c0_15, %c0_16], %19 {strides = array<i32>} : memref<1x64xf32, #tpu.memory_space<vmem>>, vector<1x64xf32>,
    } else {
    }
    %c0 = arith.constant 0 : index
    %c0_1 = arith.constant 0 : index
    %3 = vector.load %arg1[%c0, %c0_1] : memref<8x32xf32, #tpu.memory_space<vmem>>, vector<8x32xf32>
    %c0_2 = arith.constant 0 : index
    %c0_3 = arith.constant 0 : index
    %4 = vector.load %arg2[%c0_2, %c0_3] : memref<32x64xf32, #tpu.memory_space<vmem>>, vector<32x64xf32>
    %cst = arith.constant dense<0.000000e+00> : vector<8x64xf32>
    %5 = tpu.matmul %3, %4, %cst {dimension_numbers = #tpu.dot_dimension_numbers<[1], [0], [0], [1], [0, 0, 1, 1], [], []>} : vector<8x32xf32>, vector<32x64xf32>, vector<8x64xf32> -> vector<8x64xf32>
    %c0_4 = arith.constant 0 : index
    %c0_5 = arith.constant 0 : index
    %6 = vector.load %arg3[%c0_4, %c0_5] : memref<1x64xf32, #tpu.memory_space<vmem>>, vector<1x64xf32>
    %7 = vector.broadcast %6 : vector<1x64xf32> to vector<8x64xf32>
    %8 = arith.addf %5, %7 : vector<8x64xf32>
    %cst_6 = arith.constant 0.000000e+00 : f32
    %9 = vector.broadcast %cst_6 : f32 to vector<8x64xf32>
    %10 = arith.maximumf %8, %9 : vector<8x64xf32>
    %c0_7 = arith.constant 0 : index
    %c0_8 = arith.constant 0 : index
    %11 = vector.load %arg7[%c0_7, %c0_8] : memref<1x64xf32, #tpu.memory_space<vmem>>, vector<1x64xf32>
    %cst_9 = arith.constant dense<0.000000e+00> : vector<64xf32>
    %12 = vector.multi_reduction <add>, %10, %cst_9 [0] : vector<8x64xf32> to vector<64xf32>
    %13 = vector.shape_cast %12 : vector<64xf32> to vector<1x64xf32>
    %14 = arith.addf %11, %13 : vector<1x64xf32>
    %c0_10 = arith.constant 0 : index
    %c0_11 = arith.constant 0 : index
    %15 = vector.load %arg7[%c0_10, %c0_11] : memref<1x64xf32, #tpu.memory_space<vmem>>, vector<1x64xf32>
    tpu.vector_store %arg7[%c0_10, %c0_11], %14 {strides = array<i32>} : memref<1x64xf32, #tpu.memory_space<vmem>>, vector<1x64xf32>,
    %c0_i32_12 = arith.constant 0 : i32
    %16 = arith.cmpi eq, %arg0, %c0_i32_12 : i32
    %17 = arith.extui %16 : i1 to i32
    %c0_i32_13 = arith.constant 0 : i32
    %18 = arith.cmpi ne, %17, %c0_i32_13 : i32
    scf.if %18 {
      %c0_14 = arith.constant 0 : index
      %c0_15 = arith.constant 0 : index
      %19 = vector.load %arg7[%c0_14, %c0_15] : memref<1x64xf32, #tpu.memory_space<vmem>>, vector<1x64xf32>
      %cst_16 = arith.constant 1.250000e-01 : f32
      %20 = vector.broadcast %cst_16 : f32 to vector<1x64xf32>
      %21 = arith.mulf %19, %20 : vector<1x64xf32>
      %c0_17 = arith.constant 0 : index
      %c0_18 = arith.constant 0 : index
      %22 = vector.load %arg4[%c0_17, %c0_18] : memref<64x20xf32, #tpu.memory_space<vmem>>, vector<64x20xf32>
      %cst_19 = arith.constant dense<0.000000e+00> : vector<1x20xf32>
      %23 = tpu.matmul %21, %22, %cst_19 {dimension_numbers = #tpu.dot_dimension_numbers<[1], [0], [0], [1], [0, 0, 1, 1], [], []>} : vector<1x64xf32>, vector<64x20xf32>, vector<1x20xf32> -> vector<1x20xf32>
      %c0_20 = arith.constant 0 : index
      %c0_21 = arith.constant 0 : index
      %24 = vector.load %arg5[%c0_20, %c0_21] : memref<1x20xf32, #tpu.memory_space<vmem>>, vector<1x20xf32>
      %25 = arith.addf %23, %24 : vector<1x20xf32>
      %c0_22 = arith.constant 0 : index
      %c0_23 = arith.constant 0 : index
      %26 = vector.load %arg6[%c0_22, %c0_23] : memref<1x20xf32, #tpu.memory_space<vmem>>, vector<1x20xf32>
      tpu.vector_store %arg6[%c0_22, %c0_23], %25 {strides = array<i32>} : memref<1x20xf32, #tpu.memory_space<vmem>>, vector<1x20xf32>,
    } else {
    }
    return
  }
  func.func @transform_0(%arg0: i32) -> (i32, i32) {
    %c0_i32 = arith.constant 0 : i32
    %c0_i32_0 = arith.constant 0 : i32
    return %arg0, %c0_i32 : i32, i32
  }
  func.func @transform_1(%arg0: i32) -> (i32, i32) {
    %c0_i32 = arith.constant 0 : i32
    %c0_i32_0 = arith.constant 0 : i32
    %c0_i32_1 = arith.constant 0 : i32
    return %c0_i32, %c0_i32_0 : i32, i32
  }
  func.func @transform_2(%arg0: i32) -> (i32, i32) {
    %c0_i32 = arith.constant 0 : i32
    %c0_i32_0 = arith.constant 0 : i32
    %c0_i32_1 = arith.constant 0 : i32
    return %c0_i32, %c0_i32_0 : i32, i32
  }
  func.func @transform_3(%arg0: i32) -> (i32, i32) {
    %c0_i32 = arith.constant 0 : i32
    %c0_i32_0 = arith.constant 0 : i32
    %c0_i32_1 = arith.constant 0 : i32
    return %c0_i32, %c0_i32_0 : i32, i32
  }
  func.func @transform_4(%arg0: i32) -> (i32, i32) {
    %c0_i32 = arith.constant 0 : i32
    %c0_i32_0 = arith.constant 0 : i32
    %c0_i32_1 = arith.constant 0 : i32
    return %c0_i32, %c0_i32_0 : i32, i32
  }
  func.func @transform_5(%arg0: i32) -> (i32, i32) {
    %c0_i32 = arith.constant 0 : i32
    %c0_i32_0 = arith.constant 0 : i32
    %c0_i32_1 = arith.constant 0 : i32
    return %c0_i32, %c0_i32_0 : i32, i32
  }
}

</mosaic_0001>

<bundles_post_ra>
// kernel: tpu_custom_call.1
= control target key start
LH: loop header
LB: loop body
LE: loop exit
PB: predicated region body
PF: predicated region fallthrough
CT: control target
= control target key end

     0   :  { %vm25_vm0 = vcmask 516096   ;;  %v322_v3 = vmov 0.0|0.0   ;;  %v323_v6 = vmov 0.0   ;;  %vm324_vm1 = vmmov 0   ;;  %s415_s0 = inlined_call_operand.vmem [shape: f32[8,32], index: 0, kind: input, shape index: {}]   ;;  %s416_s1 = inlined_call_operand.vmem [shape: f32[32,64], index: 1, kind: input, shape index: {}]   ;;  %s417_s2 = inlined_call_operand.vmem [shape: f32[1,64], index: 2, kind: input, shape index: {}]   ;;  %s418_s3 = inlined_call_operand.vmem [shape: f32[64,20], index: 3, kind: input, shape index: {}]   ;;  %s419_s4 = inlined_call_operand.vmem [shape: f32[1,20], index: 4, kind: input, shape index: {}]   ;;  %s420_s5 = inlined_call_operand.hbm [shape: f32[1,20], index: 5, kind: output, shape index: {}]  }
   0x1   :  { %v28_v0 = vld [vmem:[%s416_s1] sm:$0xff]  ;;  %v29_v1 = vld [vmem:[%s416_s1 + $0x8] sm:$0xff]  ;;  %v30_v2 = vld [vmem:[%s416_s1 + $0x10] sm:$0xff]  ;;  %276 = vmatprep.subr.bf16.mxu0 %v322_v3  ;;  %26 = vst.msk [vmem:[#allocation2] sm:$0x1] %vm25_vm0, %v323_v6  ;;  %282 = vmatprep.subr.bf16.mxu1 %v322_v3 }
   0x2   :  { %v277_v4 = vpack.c.bf16 %v29_v1, %v28_v0  ;;  %v31_v5 = vld [vmem:[%s416_s1 + $0x18] sm:$0xff]  ;;  %254 = vmatprep.mubr.msk.f32.mxu0 %vm324_vm1, %v323_v6  ;;  %273 = vmatprep.mubr.msk.f32.mxu1 %vm324_vm1, %v323_v6 }
   0x3   :  { %10 = vsyncpa [#allocation4], 0  ;;  %v280_v7 = vpack.c.bf16 %v31_v5, %v30_v2  ;;  %v27_v8 = vld [vmem:[%s415_s0] sm:$0xff]  ;;  %vm39_vm2 = vcmask 261120   ;;  %v132_v10 = vld [vmem:[%s418_s3 + $0x8] sm:$0xff]  ;;  %vm115_vm3 = vcmask 523264  }
   0x4   :  { %278 = vmatpush3.bf16.msra.mxu0 %v277_v4  ;;  %v131_v9 = vld [vmem:[%s418_s3] sm:$0xff]  ;;  %v133_v12 = vld [vmem:[%s418_s3 + $0x10] sm:$0xff]  ;;  %v134_v13 = vld [vmem:[%s418_s3 + $0x18] sm:$0xff]  ;;  %s325_s19 = smov [#allocation3]   ;;  %vm213_vm4 = vcmask 155648  }
   0x5   :  { %279 = vmatprep.subr.bf16.mxu0 %v322_v3  ;;  %v283_v11 = vpack.c.bf16 %v132_v10, %v131_v9  ;;  %v286_v14 = vpack.c.bf16 %v134_v13, %v133_v12  ;;  %v135_v15 = vld [vmem:[%s418_s3 + $0x20] sm:$0xff]  ;;  %v136_v16 = vld [vmem:[%s418_s3 + $0x28] sm:$0xff]  ;;  %v137_v17 = vld [vmem:[%s418_s3 + $0x30] sm:$0xff]  ;;  %s221_s20 = sshll.u32 %s325_s19, 4  ;;  %s222_s20 = int_to_ptr.vmem [resolvable:$true] %s221_s20 }
   0x6   :  { %v289_v18 = vpack.c.bf16 %v136_v16, %v135_v15  ;;  %v138_v19 = vld [vmem:[%s418_s3 + $0x38] sm:$0xff]  ;;  %v229_v21 = vld [vmem:[%s417_s2] ss:$0 sm:$0xff]  ;;  %s298_s21 = scalar_lea.vmem %s222_s20, 16  ;;  %s302_s22 = scalar_lea.vmem %s222_s20, 32 }
   0x7   :  { %284 = vmatpush3.bf16.msra.mxu1 %v283_v11  ;;  %v292_v20 = vpack.c.bf16 %v138_v19, %v137_v17  ;;  %v139_v37 = vld [vmem:[%s419_s4] sm:$0x1]  ;;  %p299_p0 = scmp.ne.s32.totalorder %s222_s20, %s298_s21  ;;  %p303_p1 = scmp.lt.s32.totalorder %s222_s20, %s222_s20 }
   0x8   :  { %281 = vmatpush3.bf16.msra.mxu0 %v280_v7  ;;  %285 = vmatprep.subr.bf16.mxu1 %v322_v3  ;;  %v114_v32 = vld [vmem:[#allocation2] sm:$0x1]  ;;  %p304_p2 = scmp.lt.s32.totalorder %s302_s22, %s298_s21 }
   0xa   :  { %p305_p3 = por %p304_p2, %p303_p1 }
   0xb   :  { %255 = vmatmul.mubr.msk.f32.vlgmr.msra.gmra.mrb[0].mxu0 %vm39_vm2, %v27_v8  ;;  %287 = vmatpush3.bf16.msra.mxu1 %v286_v14 }
   0xc   :  { %288 = vmatprep.subr.bf16.mxu1 %v322_v3  ;;  %p306_p4 = pnand %p305_p3, %p299_p0 }
   0xf   :  { %290 = vmatpush3.bf16.msra.mxu1 %v289_v18 }
  0x10   :  { %291 = vmatprep.subr.bf16.mxu1 %v322_v3 }
  0x13   :  { %293 = vmatpush3.bf16.msra.mxu1 %v292_v20 }
  0xde   :  { %v109_v22 = vpop.f32.mrb[0].mxu0 }
  0xdf   :  { %v110_v23 = vadd.f32 %v229_v21, %v109_v22  ;;  %v256_v24 = vpop.f32.mrb[1].mxu0 }
  0xe1   :  { %v113_v25 = vmax.f32 %v110_v23, 0.0 }
  0xe3   :  { %v116_v26 = vsel %vm115_vm3, %v113_v25, 0.0 }
  0xe4   :  { %v117_v27 = vrot.slane %v116_v26, 4 }
  0xe6   :  { %v118_v28 = vadd.f32 %v117_v27, %v116_v26 }
  0xe8   :  { %v119_v29 = vrot.slane %v118_v28, 2 }
  0xea   :  { %v120_v30 = vadd.f32 %v119_v29, %v118_v28 }
  0xec   :  { %v121_v31 = vrot.slane %v120_v30, 1 }
  0xee   :  { %v122_v33 = vadd.f32 %v121_v31, %v120_v30 }
  0xf0   :  { %v123_v34 = vadd.f32 %v122_v33, %v114_v32 }
  0xf2   :  { %125 = vst.msk [vmem:[#allocation2] sm:$0x1] %vm25_vm0, %v123_v34 }
  0xf9   :  { %v129_v35 = vld [vmem:[#allocation2] sm:$0x1] }
  0xfa   :  { %v130_v36 = vmul.f32 0.125, %v129_v35 }
  0xfc   :  { %274 = vmatmul.mubr.msk.f32.vlgmr.msra.gmra.mrb[0].mxu1 %vm115_vm3, %v130_v36 }
 0x1cf   :  { %v209_v38 = vpop.f32.mrb[0].mxu1 }
 0x1d0   :  { %v210_v39 = vadd.f32 %v209_v38, %v139_v37  ;;  %v275_v40 = vpop.f32.mrb[1].mxu1 }
 0x1d2   :  { %214 = vst.msk [vmem:[#allocation3] sm:$0x1] %vm213_vm4, %v210_v39 }
 0x1d3   :  { %309 = shalt.err (!%p306_p4)
}
 0x1d4   :  { %s310_s4 = scalar_lea.hbm %s420_s5, 16 }
 0x1d5   :  { %p311_p5 = scmp.ne.s32.totalorder %s420_s5, %s310_s4  ;;  %p314_p6 = scmp.lt.u32.totalorder %s310_s4, %s420_s5 }
 0x1d7   :  { %p316_p7 = pnand %p314_p6, %p311_p5 }
 0x1d9   :  { %319 = shalt.err (!%p316_p7)
}
 0x1da   :  { %224 = dma.vmem_to_hbm [thread:$0]  %s222_s20, 16, %s420_s5, [#allocation4]  }
 0x1db   :  { %320 = dma.done.wait [#allocation4], 16  }
 0x1dc   :  { %321 = vsyncadd [#allocation4], 4294967280 }
 0x1dd   :  { %228 = vsyncpa [#allocation4], 1 }

</bundles_post_ra>
